<compile_context>
chip_gen: v7x
topology: tpu7x:2x2x1
jax: 0.10.0
libtpu: 0.0.40
codegen_flags: <defaults>
</compile_context>

<pallas_src>
import math

import jax
import jax.numpy as jnp
from jax.experimental import pallas as pl
from jax.experimental.pallas import tpu as pltpu


# ------------------------- module "constructor" (host) ------------------------

def make_positional_encoding(emb_dim, max_len, freq=10000.0, dtype=jnp.float32):
    """Equivalent of PositionalEncoding.__init__: builds the constant PE table."""
    assert emb_dim > 0 and max_len > 0, "emb_dim and max_len must be positive"
    pos = jnp.arange(max_len, dtype=jnp.float32)[:, None]                  # (max_len, 1)
    div = jnp.power(
        jnp.float32(freq),
        jnp.arange(0, emb_dim, 2, dtype=jnp.float32) / jnp.float32(emb_dim))
    pe = jnp.zeros((max_len, emb_dim), jnp.float32)
    pe = pe.at[:, 0::2].set(jnp.sin(pos / div))
    cos_div = div if emb_dim % 2 == 0 else div[:-1]
    pe = pe.at[:, 1::2].set(jnp.cos(pos / cos_div))
    return pe.astype(dtype)


# --------------------------------- the kernel --------------------------------

def _pe_add_kernel(x_ref, pe_ref, o_ref):
    # x_ref: (bb, L, D), pe_ref: (L, D) -> broadcast add over the batch tile.
    o_ref[...] = (x_ref[...] + pe_ref[...]).astype(o_ref.dtype)


# --------------------------------- the wrapper --------------------------------

def positional_encoding_forward(x, pe, length=None, *, batch_block=1):
    """out = x + pe[:length, :]; length defaults to x.shape[-2] (static)."""
    if length is None:
        length = x.shape[-2]
    # TODO(synk): `length` must be a static Python int here; a traced/dynamic
    # length would need pl.ds-based dynamic slicing of the PE table.
    L = int(length)
    D = x.shape[-1]
    assert x.shape[-2] == L, "seq dim of x must match `length` for the broadcast add"
    assert pe.shape[0] >= L and pe.shape[1] == D

    orig_shape = x.shape
    lead = x.shape[:-2]
    B = int(math.prod(lead)) if lead else 1
    x3 = x.reshape(B, L, D)

    # Choose a batch tile that divides B (bb=1 keeps B parallel steps, which is
    # the right megacore split for small B; grow bb for large B to amortize
    # per-step overhead).
    bb = max(1, min(int(batch_block), B))
    while B % bb:
        bb -= 1
    grid = (B // bb,)

    out = pl.pallas_call(
        _pe_add_kernel,
        out_shape=jax.ShapeDtypeStruct((B, L, D), x.dtype),
        grid=grid,
        in_specs=[
            pl.BlockSpec((bb, L, D), lambda b: (b, 0, 0)),   # x batch tile
            pl.BlockSpec((L, D), lambda b: (0, 0)),          # pe rows [0:L)
        ],
        out_specs=pl.BlockSpec((bb, L, D), lambda b: (b, 0, 0)),
        compiler_params=pltpu.CompilerParams(
            dimension_semantics=("parallel",)),
    )(x3, pe)
    return out.reshape(orig_shape)


# ---------------------------- pure-JAX reference -----------------------------

def ref_positional_encoding_forward(x, pe, length=None):
    if length is None:
        length = x.shape[-2]
    return x + pe[:length, :]


# ------------------------------------ main ------------------------------------

if __name__ == "__main__":
    B, L, D = 2, 8, 128          # batch, seq, emb_dim (lane-dense: D == 128)
    max_len = 16

    key = jax.random.PRNGKey(0)
    x = jax.random.normal(key, (B, L, D), dtype=jnp.float32)
    pe = make_positional_encoding(D, max_len)

    out = positional_encoding_forward(x, pe)
    out = jax.block_until_ready(out)

    ref = ref_positional_encoding_forward(x, pe)
    assert out.shape == (B, L, D)
    assert jnp.allclose(out, ref, rtol=1e-6, atol=1e-6), \
        f"max abs err {jnp.max(jnp.abs(out - ref))}"

    print("KERNEL_OK")
</pallas_src>

<mosaic_0001>
module attributes {stable_mosaic.version = 11 : i64} {
  func.func @_pe_add_kernel(%arg0: i32, %arg1: memref<1x8x128xf32, #tpu.memory_space<vmem>>, %arg2: memref<8x128xf32, #tpu.memory_space<vmem>>, %arg3: memref<1x8x128xf32, #tpu.memory_space<vmem>>) attributes {dimension_semantics = [#tpu.dimension_semantics<parallel>], iteration_bounds = array<i64: 2>, scalar_prefetch = 0 : i64, scratch_operands = 0 : i64, tpu.core_type = #tpu.core_type<tc>, window_params = [{transform_indices = @transform_0, window_bounds = array<i64: 1, 8, 128>}, {transform_indices = @transform_1, window_bounds = array<i64: 8, 128>}, {transform_indices = @transform_2, window_bounds = array<i64: 1, 8, 128>}]} {
    %c0 = arith.constant 0 : index
    %c0_0 = arith.constant 0 : index
    %c0_1 = arith.constant 0 : index
    %0 = vector.load %arg1[%c0, %c0_0, %c0_1] : memref<1x8x128xf32, #tpu.memory_space<vmem>>, vector<1x8x128xf32>
    %c0_2 = arith.constant 0 : index
    %c0_3 = arith.constant 0 : index
    %1 = vector.load %arg2[%c0_2, %c0_3] : memref<8x128xf32, #tpu.memory_space<vmem>>, vector<8x128xf32>
    %2 = vector.shape_cast %1 : vector<8x128xf32> to vector<1x8x128xf32>
    %3 = arith.addf %0, %2 : vector<1x8x128xf32>
    %c0_4 = arith.constant 0 : index
    %c0_5 = arith.constant 0 : index
    %c0_6 = arith.constant 0 : index
    %4 = vector.load %arg3[%c0_4, %c0_5, %c0_6] : memref<1x8x128xf32, #tpu.memory_space<vmem>>, vector<1x8x128xf32>
    tpu.vector_store %arg3[%c0_4, %c0_5, %c0_6], %3 {strides = array<i32>} : memref<1x8x128xf32, #tpu.memory_space<vmem>>, vector<1x8x128xf32>,
    return
  }
  func.func @transform_0(%arg0: i32) -> (i32, i32, i32) {
    %c0_i32 = arith.constant 0 : i32
    %c0_i32_0 = arith.constant 0 : i32
    %c0_i32_1 = arith.constant 0 : i32
    return %arg0, %c0_i32, %c0_i32_0 : i32, i32, i32
  }
  func.func @transform_1(%arg0: i32) -> (i32, i32) {
    %c0_i32 = arith.constant 0 : i32
    %c0_i32_0 = arith.constant 0 : i32
    %c0_i32_1 = arith.constant 0 : i32
    return %c0_i32, %c0_i32_0 : i32, i32
  }
  func.func @transform_2(%arg0: i32) -> (i32, i32, i32) {
    %c0_i32 = arith.constant 0 : i32
    %c0_i32_0 = arith.constant 0 : i32
    %c0_i32_1 = arith.constant 0 : i32
    return %arg0, %c0_i32, %c0_i32_0 : i32, i32, i32
  }
}

</mosaic_0001>

<bundles_post_ra>
// kernel: tpu_custom_call.1
= control target key start
LH: loop header
LB: loop body
LE: loop exit
PB: predicated region body
PF: predicated region fallthrough
CT: control target
= control target key end

     0   :  { %7 = vsyncpa [#allocation3], 0  ;;  %s700_s0 = inlined_call_operand.hbm [shape: f32[2,8,128], index: 0, kind: input, shape index: {}]   ;;  %s701_s1 = inlined_call_operand.hbm [shape: f32[16,128], index: 1, kind: input, shape index: {}]   ;;  %s702_s2 = inlined_call_operand.hbm [shape: f32[2,8,128], index: 2, kind: output, shape index: {}]  }
   0x1   :  { %9 = vsyncpa [#allocation3 + $0x1], 0 }
   0x2   :  { %10 = vsyncpa [#allocation6], 0 }
   0x3   :  { %11 = vsyncpa [#allocation4], 0 }
   0x4   :  { %13 = vsyncpa [#allocation4 + $0x1], 0  ;;  %s489_s9 = smov 0   ;;  %s491_s10 = smov 0  }
   0x5   :  { %s493_s11 = smov 0   ;;  %s495_s12 = smov 0  }
   0x6 LB: > { %s510_s13 = sadd.s32 4294967295, %s469_s12   ;;  %s270_s14 = sadd.s32 4294967294, %s469_s12   ;;  %s469_s12 = sphi %s495_s12, %s726_s12   ;;  %s465_s11 = sphi %s493_s11, %s725_s11   ;;  %s461_s10 = sphi %s491_s10, %s724_s10   ;;  %s457_s9 = sphi %s489_s9, %s723_s9  }
   0x7   : > { %p39_p0 = scmp.ne.s32.totalorder %s461_s10, %s457_s9  ;;  %p703_p1 = scmp.eq.s32.totalorder %s510_s13, 0 }
   0x8   : > { %p90_p3 = scmp.eq.s32.totalorder %s270_s14, 1  ;;  %p271_p5 = scmp.ge.s32.totalorder %s469_s12, 1 }
   0x9   : > { %p519_p4 = por %p703_p1, %p39_p0  ;;  %p97_p7 = scmp.lt.s32.totalorder %s469_s12, 3 }
   0xa   : > { %p524_p6 = por %p90_p3, %p39_p0  ;;  %s471_s18 = smov [#allocation5]  }
   0xb   : > { %s706_s15 = scalar_select %p519_p4, 1, 0 }
   0xc   : > { %s707_s16 = scalar_select %p524_p6, 1, 0 }
   0xd   : > { %p529_p8 = pnand %p271_p5, %p97_p7  ;;  %s110_s19 = sshll.u32 %s471_s18, 4  ;;  %s533_s19 = int_to_ptr.vmem [resolvable:$true] %s110_s19 }
   0xe   : > { %s539_s20 = sadd.s32 1, %s469_s12   ;;  %s26_s24 = sadd.s32 1, %s465_s11 }
   0xf   : > { %s708_s17 = scalar_select %p529_p8, 1, 0 }
  0x10   : > { %p292_p10 = pneg %p529_p8  ;;  %s23_s22 = ssub.s32 %s469_s12, %s539_s20 }
  0x11   : > { %p549_p12 = scmp.eq.s32.totalorder %s23_s22, 0  ;;  %s341_s27 = scalar_lea.hbm %s701_s1, 128 }
  0x12   : > { %p543_p11 = pnand %p292_p10, %p703_p1  ;;  %p342_p0 = scmp.ne.s32.totalorder %s701_s1, %s341_s27 }
  0x13   : > { %s710_s23 = scalar_select %p549_p12, 1, 0 }
  0x14   : > { %p343_p3 = pneg %p543_p11  ;;  %s346_s4 = scalar_lea.hbm %s701_s1, 256 }
  0x15   : > { %p347_p10 = scmp.lt.u32.totalorder %s346_s4, %s341_s27  ;;  %p348_p9 = scmp.lt.u32.totalorder %s341_s27, %s701_s1 }
  0x16   : > { %p344_p5 = pnand %p343_p3, %p342_p0 }
  0x17   : > { %p349_p1 = por %p348_p9, %p347_p10 }
  0x18   : > { %p345_p7 = pneg %p344_p5 }
  0x1a   : > { %p350_p2 = pnand %p349_p1, %p345_p7 }
  0x1c   : > { %353 = shalt.err (!%p350_p2)
}
  0x1d   : > { %s354_s7 = scalar_lea.vmem %s533_s19, 128  ;;  %p362_p5 = scmp.lt.s32.totalorder %s533_s19, %s533_s19 }
  0x1e   : > { %p355_p13 = scmp.ne.s32.totalorder %s533_s19, %s354_s7  ;;  %p363_p4 = scmp.lt.s32.totalorder %s354_s7, %s354_s7 }
  0x20   : > { %p357_p6 = pnand %p355_p13, %p343_p3  ;;  %p364_p8 = por %p363_p4, %p362_p5 }
  0x22   : > { %p358_p0 = pneg %p357_p6 }
  0x24   : > { %p365_p12 = pnand %p364_p8, %p358_p0 }
  0x26   : > { %368 = shalt.err (!%p365_p12)
}
  0x27   : > { %295 = dma.hbm_to_vmem [thread:$0]  (!%p543_p11), %s701_s1, 128, %s533_s19, [#allocation6]  }
  0x28   : > { %p711_p1 = scmp.ne.s32.totalorder %s710_s23, 0  ;;  %p34_p2 = scmp.eq.s32.totalorder %s469_s12, 0 }
  0x29   : > { %p712_p4 = scmp.ne.s32.totalorder %s465_s11, %s461_s10  ;;  %p713_p6 = scmp.eq.s32.totalorder %s510_s13, 1 }
  0x2a   : > { %s583_s18 = scalar_select %p711_p1, %s465_s11, %s26_s24  }
  0x2b   : > { %p591_p8 = por %p713_p6, %p712_p4  ;;  %p305_p9 = scmp.lt.s32.totalorder %s469_s12, 2 }
  0x2c   : > { %s121_s22 = sand.u32 1, %s465_s11   ;;  %p715_p12 = pmov %p712_p4 }
  0x2d   : > { %s274_s25 = sshll.u32 %s121_s22, 3  ;;  %s275_s26 = sshll.u32 %s469_s12, 7 }
  0x2e   : > { %p35_p13 = por %p34_p2, %p715_p12  ;;  %s604_s19 = scalar_lea.hbm %s700_s0, %s275_s26 }
  0x2f   : > { %s125_s23 = scalar_lea.vmem [#allocation2], %s274_s25  ;;  %s122_s30 = scalar_lea.sflag [#allocation3], %s121_s22 }
  0x30   : > { %s132_s24 = sshll.u32 %s125_s23, 4  ;;  %p606_p11 = pnand %p305_p9, %p35_p13  ;;  %s610_s24 = int_to_ptr.vmem [resolvable:$true] %s132_s24 }
  0x31   : > { %s369_s3 = scalar_lea.hbm %s604_s19, 128  ;;  %s374_s6 = scalar_lea.hbm %s700_s0, 256 }
  0x32   : > { %p370_p3 = scmp.ne.s32.totalorder %s604_s19, %s369_s3  ;;  %p371_p7 = pneg %p606_p11 }
  0x33   : > { %p375_p5 = scmp.lt.u32.totalorder %s604_s19, %s700_s0  ;;  %p376_p1 = scmp.lt.u32.totalorder %s374_s6, %s369_s3 }
  0x34   : > { %p372_p10 = pnand %p371_p7, %p370_p3  ;;  %p378_p4 = scmp.lt.u32.totalorder %s369_s3, %s604_s19 }
  0x35   : > { %p377_p2 = por %p376_p1, %p375_p5 }
  0x36   : > { %p373_p0 = pneg %p372_p10 }
  0x37   : > { %p379_p6 = por %p378_p4, %p377_p2 }
  0x39   : > { %p380_p9 = pnand %p379_p6, %p373_p0 }
  0x3b   : > { %383 = shalt.err (!%p380_p9)
}
  0x3c   : > { %s384_s14 = scalar_lea.vmem %s610_s24, 128  ;;  %s472_s22 = smov [#allocation2]  }
  0x3d   : > { %p385_p12 = scmp.ne.s32.totalorder %s610_s24, %s384_s14  ;;  %s389_s25 = sshll.u32 %s472_s22, 4  ;;  %s390_s25 = int_to_ptr.vmem [resolvable:$false] %s389_s25 }
  0x3e   : > { %s391_s26 = scalar_lea.vmem %s390_s25, 256  ;;  %p392_p10 = scmp.lt.s32.totalorder %s610_s24, %s390_s25 }
  0x3f   : > { %p387_p13 = pnand %p385_p12, %p371_p7  ;;  %p393_p5 = scmp.lt.s32.totalorder %s391_s26, %s384_s14 }
  0x41   : > { %p388_p3 = pneg %p387_p13  ;;  %p394_p1 = por %p393_p5, %p392_p10 }
  0x43   : > { %p395_p2 = pnand %p394_p1, %p388_p3 }
  0x45   : > { %398 = shalt.err (!%p395_p2)
}
  0x46   : > { %299 = dma.hbm_to_vmem [thread:$0]  (!%p606_p11), %s604_s19, 128, %s610_s24, %s122_s30  }
  0x47   : > { %p717_p0 = scmp.ne.s32.totalorder %s708_s17, 0 }
  0x48   : > { %s640_s27 = sand.u32 (!%p717_p0), 1, %s461_s10   ;;  %p718_p7 = scmp.ne.s32.totalorder (!%p717_p0), %s706_s15, 0 }
  0x49   : > { %141 = sbr.rel (%p717_p0) target bundleno = 109 (0x6d), region = 28  ;;  %s277_s28 = sshll.u32 (!%p717_p0), %s640_s27, 3 }
  0x4a   : > { %s144_s23 = scalar_lea.sflag (!%p717_p0), [#allocation3], %s640_s27  ;;  %s147_s3 = scalar_lea.vmem (!%p717_p0), [#allocation2], %s277_s28 }
  0x50   : > { %444 = dma.done.wait (%p718_p7), %s144_s23, 128  }
  0x51   : > { %446 = vsyncadd (%p718_p7), %s144_s23, 4294967168  ;;  %p719_p4 = scmp.eq.s32.totalorder %s510_s13, 0 }
  0x53   : > { %448 = dma.done.wait (%p719_p4), [#allocation6], 128   ;;  %p720_p11 = pmov %p719_p4 }
  0x54   : > { %s171_s17 = scalar_lea.vmem [#allocation7], %s277_s28  ;;  %s281_s24 = sshll.u32 %s510_s13, 7  ;;  %v172_v0 = vld [vmem:[%s147_s3] sm:$0xff]  ;;  %v173_v1 = vld [vmem:[#allocation5] sm:$0xff] }
  0x55   : > { %450 = vsyncadd (%p720_p11), [#allocation6], 4294967168  ;;  %s190_s19 = sshll.u32 %s171_s17, 4  ;;  %v174_v2 = vadd.f32 %v173_v1, %v172_v0  ;;  %s658_s30 = scalar_lea.hbm %s702_s2, %s281_s24  ;;  %s653_s19 = int_to_ptr.vmem [resolvable:$true] %s190_s19 }
  0x56   : > { %s177_s4 = scalar_lea.sflag [#allocation4], %s640_s27  ;;  %s399_s5 = scalar_lea.vmem %s653_s19, 128 }
  0x57   : > { %175 = vst [vmem:[%s171_s17] sm:$0xff] %v174_v2  ;;  %p400_p6 = scmp.ne.s32.totalorder %s653_s19, %s399_s5  ;;  %s473_s13 = smov [#allocation7]  }
  0x58   : > { %s403_s6 = sshll.u32 %s473_s13, 4  ;;  %s404_s6 = int_to_ptr.vmem [resolvable:$false] %s403_s6 }
  0x59   : > { %p401_p9 = pnand %p400_p6, %p591_p8  ;;  %s405_s7 = scalar_lea.vmem %s404_s6, 256 }
  0x5a   : > { %p406_p13 = scmp.lt.s32.totalorder %s653_s19, %s404_s6  ;;  %p407_p3 = scmp.lt.s32.totalorder %s405_s7, %s399_s5 }
  0x5b   : > { %p402_p12 = pneg %p401_p9 }
  0x5c   : > { %p408_p10 = por %p407_p3, %p406_p13 }
  0x5e   : > { %p409_p5 = pnand %p408_p10, %p402_p12 }
  0x60   : > { %412 = shalt.err (!%p409_p5)
}
  0x61   : > { %s413_s8 = scalar_lea.hbm %s658_s30, 128  ;;  %s417_s25 = scalar_lea.hbm %s702_s2, 256 }
  0x62   : > { %p414_p1 = scmp.ne.s32.totalorder %s658_s30, %s413_s8  ;;  %p418_p7 = scmp.lt.u32.totalorder %s658_s30, %s702_s2 }
  0x63   : > { %p419_p4 = scmp.lt.u32.totalorder %s417_s25, %s413_s8  ;;  %p421_p6 = scmp.lt.u32.totalorder %s413_s8, %s658_s30 }
  0x64   : > { %p415_p2 = pnand %p414_p1, %p591_p8 }
  0x65   : > { %p420_p11 = por %p419_p4, %p418_p7 }
  0x66   : > { %p416_p0 = pneg %p415_p2 }
  0x67   : > { %p422_p9 = por %p421_p6, %p420_p11 }
  0x69   : > { %p423_p12 = pnand %p422_p9, %p416_p0 }
  0x6b   : > { %426 = shalt.err (!%p423_p12)
}
  0x6c   : > { %290 = dma.vmem_to_hbm [thread:$0]  (%p591_p8), %s653_s19, 128, %s658_s30, %s177_s4  }
  0x6d PF: > { %s202_s28 = sand.u32 1, %s457_s9   ;;  %p721_p13 = scmp.ne.s32.totalorder %s707_s16, 0 }
  0x6e   : > { %p722_p3 = scmp.ge.s32.totalorder %s469_s12, 2  ;;  %s203_s23 = scalar_lea.sflag [#allocation4], %s202_s28 }
  0x70   : > { %p301_p10 = pnand %p722_p3, %p721_p13 }
  0x72   : > { %452 = dma.done.wait (!%p301_p10), %s203_s23, 128  }
  0x73   : > { %454 = vsyncadd (!%p301_p10), %s203_s23, 4294967168  ;;  %p16_p5 = scmp.ge.s32.totalorder %s539_s20, 4   ;;  %s723_s9 = smov %s461_s10 }
  0x74   : > { %s724_s10 = smov %s465_s11  ;;  %s725_s11 = smov %s583_s18 }
  0x75   : > { %s726_s12 = smov %s539_s20  ;;  %18 = sbr.rel (!%p16_p5) target bundleno = 6 (0x6), region = 77 }
  0x7c   :  { %208 = vsyncpa [#allocation3], 1 }
  0x7d   :  { %210 = vsyncpa [#allocation3 + $0x1], 1 }
  0x7e   :  { %211 = vsyncpa [#allocation6], 1 }
  0x7f   :  { %212 = vsyncpa [#allocation4], 1 }
  0x80   :  { %214 = vsyncpa [#allocation4 + $0x1], 1 }

</bundles_post_ra>
